<compile_context>
chip_gen: v7x
topology: tpu7x:2x2x1
jax: 0.10.0
libtpu: 0.0.40
codegen_flags: <defaults>
</compile_context>

<pallas_src>
import jax
import jax.numpy as jnp
from jax.experimental import pallas as pl
from jax.experimental.pallas import tpu as pltpu


# ----------------------------------------------------------------------------- helpers
def _round_up(x, m):
    return (x + m - 1) // m * m


def _tiling(B, K, N):
    """Tile sizes + padded shapes. Last two block dims are (8,128)-aligned."""
    tm = min(_round_up(B, 8), 256)      # batch tile (keep whole small batch in one tile)
    tk = min(_round_up(K, 128), 512)    # reduction (in_features) tile
    tn = min(_round_up(N, 128), 256)    # out_features tile (lane dim of rhs & output)
    return tm, tk, tn, _round_up(B, tm), _round_up(K, tk), _round_up(N, tn)


def _softplus(x):
    # Numerically stable softplus: log(1 + exp(x)) == logaddexp(x, 0).
    return jnp.logaddexp(x, 0.0)


def _pad2d(a, rows, cols):
    return jnp.zeros((rows, cols), jnp.float32).at[: a.shape[0], : a.shape[1]].set(
        a.astype(jnp.float32)
    )


def derive_noise(key, out_features, in_features):
    """Host-side iid N(0,1) noise matching the shapes of weight and bias."""
    k_w, k_b = jax.random.split(key)
    eps_w = jax.random.normal(k_w, (out_features, in_features), dtype=jnp.float32)
    eps_b = jax.random.normal(k_b, (1, out_features), dtype=jnp.float32)
    return eps_w, eps_b


# ----------------------------------------------------------------------------- kernel
def _varlinear_kernel(x_ref, wmu_ref, wrho_ref, epsw_ref,   # VMEM input tiles
                      bmu_ref, brho_ref, epsb_ref,
                      o_ref,                                 # VMEM output tile
                      acc_ref):                              # f32 VMEM accumulator scratch
    k = pl.program_id(2)            # in_features (reduction) tile index
    nk = pl.num_programs(2)

    @pl.when(k == 0)
    def _():
        acc_ref[...] = jnp.zeros_like(acc_ref)

    # Reparameterized weight sample in f32 (VPU + EUP), already laid out (K, N).
    w = wmu_ref[...] + epsw_ref[...] * _softplus(wrho_ref[...])         # (tk, tn) f32

    # MXU matmul: bf16 operands, f32 accumulation, lane-dense rhs and output.
    acc_ref[...] += jnp.dot(
        x_ref[...].astype(jnp.bfloat16),
        w.astype(jnp.bfloat16),
        preferred_element_type=jnp.float32,
    )                                                                    # (tm, tn)

    @pl.when(k == nk - 1)
    def _():
        b = bmu_ref[...] + epsb_ref[...] * _softplus(brho_ref[...])      # (1, tn)
        o_ref[...] = (acc_ref[...] + b).astype(o_ref.dtype)


# ----------------------------------------------------------------------------- wrapper
def variational_layer_forward(x, weight_mu, weight_rho, bias_mu, bias_rho, key):
    """Sample weight/bias and apply the linear layer, matching the PyTorch module."""
    B, K = x.shape
    N = weight_mu.shape[0]
    tm, tk, tn, B_pad, K_pad, N_pad = _tiling(B, K, N)

    eps_w, eps_b = derive_noise(key, N, K)

    # Layout plumbing in the wrapper: transpose weight-shaped arrays to (in, out) and pad
    # so out_features is the (lane) minor dimension everywhere.  Padded K columns of x are
    # zero, so padded weight rows contribute nothing; padded output rows/cols are sliced.
    x_p = _pad2d(x, B_pad, K_pad)
    wmu_t = _pad2d(weight_mu.T, K_pad, N_pad)
    wrho_t = _pad2d(weight_rho.T, K_pad, N_pad)
    epsw_t = _pad2d(eps_w.T, K_pad, N_pad)
    bmu_p = _pad2d(bias_mu.reshape(1, N), 1, N_pad)
    brho_p = _pad2d(bias_rho.reshape(1, N), 1, N_pad)
    epsb_p = _pad2d(eps_b, 1, N_pad)

    grid = (B_pad // tm, N_pad // tn, K_pad // tk)
    grid_spec = pltpu.PrefetchScalarGridSpec(
        num_scalar_prefetch=0,
        grid=grid,
        in_specs=[
            pl.BlockSpec((tm, tk), lambda i, n, k: (i, k)),   # x
            pl.BlockSpec((tk, tn), lambda i, n, k: (k, n)),   # weight_mu.T
            pl.BlockSpec((tk, tn), lambda i, n, k: (k, n)),   # weight_rho.T
            pl.BlockSpec((tk, tn), lambda i, n, k: (k, n)),   # eps_w.T
            pl.BlockSpec((1, tn), lambda i, n, k: (0, n)),    # bias_mu
            pl.BlockSpec((1, tn), lambda i, n, k: (0, n)),    # bias_rho
            pl.BlockSpec((1, tn), lambda i, n, k: (0, n)),    # eps_b
        ],
        out_specs=pl.BlockSpec((tm, tn), lambda i, n, k: (i, n)),
        scratch_shapes=[pltpu.VMEM((tm, tn), jnp.float32)],
    )

    cost = pl.CostEstimate(
        flops=2 * B_pad * K_pad * N_pad,
        transcendentals=2 * K_pad * N_pad * (B_pad // tm),
        bytes_accessed=4 * (3 * K_pad * N_pad + B_pad * K_pad + B_pad * N_pad + 3 * N_pad),
    )

    out = pl.pallas_call(
        _varlinear_kernel,
        grid_spec=grid_spec,
        out_shape=jax.ShapeDtypeStruct((B_pad, N_pad), jnp.float32),
        compiler_params=pltpu.CompilerParams(
            dimension_semantics=("parallel", "parallel", "arbitrary")
        ),
        cost_estimate=cost,
    )(x_p, wmu_t, wrho_t, epsw_t, bmu_p, brho_p, epsb_p)

    return out[:B, :N]


# ----------------------------------------------------------------------------- demo
if __name__ == "__main__":
    # Small shapes consistent with the module: batch=8, in_features=32, out_features=64.
    B, in_features, out_features = 8, 32, 64

    root = jax.random.PRNGKey(0)
    k_x, k_wmu, k_wrho, k_bmu, k_brho, k_noise = jax.random.split(root, 6)

    # Deterministic synthetic parameter init (reset_parameters() is a no-op in the module).
    x = jax.random.normal(k_x, (B, in_features), dtype=jnp.float32)
    weight_mu = 0.1 * jax.random.normal(k_wmu, (out_features, in_features), dtype=jnp.float32)
    weight_rho = -3.0 + 0.1 * jax.random.normal(k_wrho, (out_features, in_features), dtype=jnp.float32)
    bias_mu = 0.1 * jax.random.normal(k_bmu, (out_features,), dtype=jnp.float32)
    bias_rho = -3.0 + 0.1 * jax.random.normal(k_brho, (out_features,), dtype=jnp.float32)

    y = variational_layer_forward(x, weight_mu, weight_rho, bias_mu, bias_rho, k_noise)
    y = jax.block_until_ready(y)
    assert y.shape == (B, out_features)
    assert bool(jnp.all(jnp.isfinite(y)))

    # Reference: same host-side noise, reparameterization + linear in pure JAX f32.
    # Tolerance accounts for bf16 MXU operands in the kernel.
    eps_w, eps_b = derive_noise(k_noise, out_features, in_features)
    w_ref = weight_mu + eps_w * jax.nn.softplus(weight_rho)
    b_ref = bias_mu + eps_b[0] * jax.nn.softplus(bias_rho)
    y_ref = x @ w_ref.T + b_ref[None, :]

    max_err = float(jnp.max(jnp.abs(y - y_ref)))
    assert jnp.allclose(y, y_ref, atol=3e-2, rtol=3e-2), f"max abs err {max_err}"
    print("KERNEL_OK")
</pallas_src>

<mosaic_0001>
module attributes {stable_mosaic.version = 11 : i64} {
  func.func @_varlinear_kernel(%arg0: i32, %arg1: i32, %arg2: i32, %arg3: memref<8x128xf32, #tpu.memory_space<vmem>>, %arg4: memref<128x128xf32, #tpu.memory_space<vmem>>, %arg5: memref<128x128xf32, #tpu.memory_space<vmem>>, %arg6: memref<128x128xf32, #tpu.memory_space<vmem>>, %arg7: memref<1x128xf32, #tpu.memory_space<vmem>>, %arg8: memref<1x128xf32, #tpu.memory_space<vmem>>, %arg9: memref<1x128xf32, #tpu.memory_space<vmem>>, %arg10: memref<8x128xf32, #tpu.memory_space<vmem>>, %arg11: memref<8x128xf32, #tpu.memory_space<vmem>>) attributes {dimension_semantics = [#tpu.dimension_semantics<parallel>, #tpu.dimension_semantics<parallel>, #tpu.dimension_semantics<arbitrary>], iteration_bounds = array<i64: 1, 1, 1>, scalar_prefetch = 0 : i64, scratch_operands = 1 : i64, tpu.core_type = #tpu.core_type<tc>, window_params = [{transform_indices = @transform_0, window_bounds = array<i64: 8, 128>}, {transform_indices = @transform_1, window_bounds = array<i64: 128, 128>}, {transform_indices = @transform_2, window_bounds = array<i64: 128, 128>}, {transform_indices = @transform_3, window_bounds = array<i64: 128, 128>}, {transform_indices = @transform_4, window_bounds = array<i64: 1, 128>}, {transform_indices = @transform_5, window_bounds = array<i64: 1, 128>}, {transform_indices = @transform_6, window_bounds = array<i64: 1, 128>}, {transform_indices = @transform_7, window_bounds = array<i64: 8, 128>}]} {
    %c0_i32 = arith.constant 0 : i32
    %0 = arith.cmpi eq, %arg2, %c0_i32 : i32
    %1 = arith.extui %0 : i1 to i32
    %c0_i32_0 = arith.constant 0 : i32
    %2 = arith.cmpi ne, %1, %c0_i32_0 : i32
    scf.if %2 {
      %cst_16 = arith.constant 0.000000e+00 : f32
      %32 = vector.broadcast %cst_16 : f32 to vector<8x128xf32>
      %c0_17 = arith.constant 0 : index
      %c0_18 = arith.constant 0 : index
      %33 = vector.load %arg11[%c0_17, %c0_18] : memref<8x128xf32, #tpu.memory_space<vmem>>, vector<8x128xf32>
      tpu.vector_store %arg11[%c0_17, %c0_18], %32 {strides = array<i32>} : memref<8x128xf32, #tpu.memory_space<vmem>>, vector<8x128xf32>,
    } else {
    }
    %c0 = arith.constant 0 : index
    %c0_1 = arith.constant 0 : index
    %3 = vector.load %arg4[%c0, %c0_1] : memref<128x128xf32, #tpu.memory_space<vmem>>, vector<128x128xf32>
    %c0_2 = arith.constant 0 : index
    %c0_3 = arith.constant 0 : index
    %4 = vector.load %arg6[%c0_2, %c0_3] : memref<128x128xf32, #tpu.memory_space<vmem>>, vector<128x128xf32>
    %c0_4 = arith.constant 0 : index
    %c0_5 = arith.constant 0 : index
    %5 = vector.load %arg5[%c0_4, %c0_5] : memref<128x128xf32, #tpu.memory_space<vmem>>, vector<128x128xf32>
    %cst = arith.constant 0.000000e+00 : f32
    %6 = vector.broadcast %cst : f32 to vector<128x128xf32>
    %7 = arith.maximumf %5, %6 : vector<128x128xf32>
    %8 = vector.broadcast %cst : f32 to vector<128x128xf32>
    %9 = arith.subf %5, %8 : vector<128x128xf32>
    %10 = arith.cmpf one, %9, %9 : vector<128x128xf32>
    %11 = vector.broadcast %cst : f32 to vector<128x128xf32>
    %12 = arith.addf %5, %11 : vector<128x128xf32>
    %13 = math.absf %9 : vector<128x128xf32>
    %cst_6 = arith.constant 0.000000e+00 : f32
    %14 = vector.broadcast %cst_6 : f32 to vector<128x128xf32>
    %15 = arith.subf %14, %13 : vector<128x128xf32>
    %16 = math.exp %15 : vector<128x128xf32>
    %17 = math.log1p %16 : vector<128x128xf32>
    %18 = arith.addf %7, %17 : vector<128x128xf32>
    %19 = arith.select %10, %12, %18 : vector<128x128xi1>, vector<128x128xf32>
    %20 = arith.mulf %4, %19 : vector<128x128xf32>
    %21 = arith.addf %3, %20 : vector<128x128xf32>
    %c0_7 = arith.constant 0 : index
    %c0_8 = arith.constant 0 : index
    %22 = vector.load %arg11[%c0_7, %c0_8] : memref<8x128xf32, #tpu.memory_space<vmem>>, vector<8x128xf32>
    %c0_9 = arith.constant 0 : index
    %c0_10 = arith.constant 0 : index
    %23 = vector.load %arg3[%c0_9, %c0_10] : memref<8x128xf32, #tpu.memory_space<vmem>>, vector<8x128xf32>
    %24 = arith.truncf %23 : vector<8x128xf32> to vector<8x128xbf16>
    %25 = arith.truncf %21 : vector<128x128xf32> to vector<128x128xbf16>
    %cst_11 = arith.constant dense<0.000000e+00> : vector<8x128xf32>
    %26 = tpu.matmul %24, %25, %cst_11 {dimension_numbers = #tpu.dot_dimension_numbers<[1], [0], [0], [1], [0, 0, 1, 1], [], []>} : vector<8x128xbf16>, vector<128x128xbf16>, vector<8x128xf32> -> vector<8x128xf32>
    %27 = arith.addf %22, %26 : vector<8x128xf32>
    %c0_12 = arith.constant 0 : index
    %c0_13 = arith.constant 0 : index
    %28 = vector.load %arg11[%c0_12, %c0_13] : memref<8x128xf32, #tpu.memory_space<vmem>>, vector<8x128xf32>
    tpu.vector_store %arg11[%c0_12, %c0_13], %27 {strides = array<i32>} : memref<8x128xf32, #tpu.memory_space<vmem>>, vector<8x128xf32>,
    %c0_i32_14 = arith.constant 0 : i32
    %29 = arith.cmpi eq, %arg2, %c0_i32_14 : i32
    %30 = arith.extui %29 : i1 to i32
    %c0_i32_15 = arith.constant 0 : i32
    %31 = arith.cmpi ne, %30, %c0_i32_15 : i32
    scf.if %31 {
      %c0_16 = arith.constant 0 : index
      %c0_17 = arith.constant 0 : index
      %32 = vector.load %arg7[%c0_16, %c0_17] : memref<1x128xf32, #tpu.memory_space<vmem>>, vector<1x128xf32>
      %c0_18 = arith.constant 0 : index
      %c0_19 = arith.constant 0 : index
      %33 = vector.load %arg9[%c0_18, %c0_19] : memref<1x128xf32, #tpu.memory_space<vmem>>, vector<1x128xf32>
      %c0_20 = arith.constant 0 : index
      %c0_21 = arith.constant 0 : index
      %34 = vector.load %arg8[%c0_20, %c0_21] : memref<1x128xf32, #tpu.memory_space<vmem>>, vector<1x128xf32>
      %cst_22 = arith.constant 0.000000e+00 : f32
      %35 = vector.broadcast %cst_22 : f32 to vector<1x128xf32>
      %36 = arith.maximumf %34, %35 : vector<1x128xf32>
      %37 = vector.broadcast %cst_22 : f32 to vector<1x128xf32>
      %38 = arith.subf %34, %37 : vector<1x128xf32>
      %39 = arith.cmpf one, %38, %38 : vector<1x128xf32>
      %40 = vector.broadcast %cst_22 : f32 to vector<1x128xf32>
      %41 = arith.addf %34, %40 : vector<1x128xf32>
      %42 = math.absf %38 : vector<1x128xf32>
      %cst_23 = arith.constant 0.000000e+00 : f32
      %43 = vector.broadcast %cst_23 : f32 to vector<1x128xf32>
      %44 = arith.subf %43, %42 : vector<1x128xf32>
      %45 = math.exp %44 : vector<1x128xf32>
      %46 = math.log1p %45 : vector<1x128xf32>
      %47 = arith.addf %36, %46 : vector<1x128xf32>
      %48 = arith.select %39, %41, %47 : vector<1x128xi1>, vector<1x128xf32>
      %49 = arith.mulf %33, %48 : vector<1x128xf32>
      %50 = arith.addf %32, %49 : vector<1x128xf32>
      %c0_24 = arith.constant 0 : index
      %c0_25 = arith.constant 0 : index
      %51 = vector.load %arg11[%c0_24, %c0_25] : memref<8x128xf32, #tpu.memory_space<vmem>>, vector<8x128xf32>
      %52 = vector.broadcast %50 : vector<1x128xf32> to vector<8x128xf32>
      %53 = arith.addf %51, %52 : vector<8x128xf32>
      %c0_26 = arith.constant 0 : index
      %c0_27 = arith.constant 0 : index
      %54 = vector.load %arg10[%c0_26, %c0_27] : memref<8x128xf32, #tpu.memory_space<vmem>>, vector<8x128xf32>
      tpu.vector_store %arg10[%c0_26, %c0_27], %53 {strides = array<i32>} : memref<8x128xf32, #tpu.memory_space<vmem>>, vector<8x128xf32>,
    } else {
    }
    return
  }
  func.func @transform_0(%arg0: i32, %arg1: i32, %arg2: i32) -> (i32, i32) {
    %c0_i32 = arith.constant 0 : i32
    return %arg0, %arg2 : i32, i32
  }
  func.func @transform_1(%arg0: i32, %arg1: i32, %arg2: i32) -> (i32, i32) {
    %c0_i32 = arith.constant 0 : i32
    return %arg2, %arg1 : i32, i32
  }
  func.func @transform_2(%arg0: i32, %arg1: i32, %arg2: i32) -> (i32, i32) {
    %c0_i32 = arith.constant 0 : i32
    return %arg2, %arg1 : i32, i32
  }
  func.func @transform_3(%arg0: i32, %arg1: i32, %arg2: i32) -> (i32, i32) {
    %c0_i32 = arith.constant 0 : i32
    return %arg2, %arg1 : i32, i32
  }
  func.func @transform_4(%arg0: i32, %arg1: i32, %arg2: i32) -> (i32, i32) {
    %c0_i32 = arith.constant 0 : i32
    %c0_i32_0 = arith.constant 0 : i32
    return %c0_i32, %arg1 : i32, i32
  }
  func.func @transform_5(%arg0: i32, %arg1: i32, %arg2: i32) -> (i32, i32) {
    %c0_i32 = arith.constant 0 : i32
    %c0_i32_0 = arith.constant 0 : i32
    return %c0_i32, %arg1 : i32, i32
  }
  func.func @transform_6(%arg0: i32, %arg1: i32, %arg2: i32) -> (i32, i32) {
    %c0_i32 = arith.constant 0 : i32
    %c0_i32_0 = arith.constant 0 : i32
    return %c0_i32, %arg1 : i32, i32
  }
  func.func @transform_7(%arg0: i32, %arg1: i32, %arg2: i32) -> (i32, i32) {
    %c0_i32 = arith.constant 0 : i32
    return %arg0, %arg1 : i32, i32
  }
}

</mosaic_0001>

<bundles_post_ra>
// kernel: tpu_custom_call.1
= control target key start
LH: loop header
LB: loop body
LE: loop exit
PB: predicated region body
PF: predicated region fallthrough
CT: control target
= control target key end

     0   :  { %12 = vsyncpa [#allocation4], 0  ;;  %s1206_s0 = inlined_call_operand.hbm [shape: f32[8,128], index: 0, kind: input, shape index: {}]   ;;  %s1207_s1 = inlined_call_operand.hbm [shape: f32[128,128], index: 1, kind: input, shape index: {}]   ;;  %s1208_s2 = inlined_call_operand.hbm [shape: f32[128,128], index: 2, kind: input, shape index: {}]   ;;  %s1209_s3 = inlined_call_operand.hbm [shape: f32[128,128], index: 3, kind: input, shape index: {}]   ;;  %s1210_s4 = inlined_call_operand.vmem [shape: f32[1,128], index: 4, kind: input, shape index: {}]   ;;  %s1211_s5 = inlined_call_operand.vmem [shape: f32[1,128], index: 5, kind: input, shape index: {}]   ;;  %s1212_s6 = inlined_call_operand.vmem [shape: f32[1,128], index: 6, kind: input, shape index: {}]   ;;  %s1213_s7 = inlined_call_operand.hbm [shape: f32[8,128], index: 7, kind: output, shape index: {}]  }
   0x1   :  { %13 = vsyncpa [#allocation7], 0 }
   0x2   :  { %14 = vsyncpa [#allocation10], 0 }
   0x3   :  { %15 = vsyncpa [#allocation5], 0  ;;  %s783_s24 = smov [#allocation6]   ;;  %s665_s28 = scalar_lea.hbm %s1207_s1, 2048 }
   0x4   :  { %s31_s25 = sshll.u32 %s783_s24, 4  ;;  %p666_p0 = scmp.ne.s32.totalorder %s1207_s1, %s665_s28  ;;  %s32_s25 = int_to_ptr.vmem [resolvable:$true] %s31_s25 }
   0x5   :  { %p669_p1 = scmp.lt.u32.totalorder %s665_s28, %s1207_s1 }
   0x7   :  { %p671_p2 = pnand %p669_p1, %p666_p0 }
   0x9   :  { %674 = shalt.err (!%p671_p2)
}
   0xa   :  { %s675_s10 = scalar_lea.vmem %s32_s25, 2048  ;;  %p680_p4 = scmp.lt.s32.totalorder %s32_s25, %s32_s25 }
   0xb   :  { %p676_p3 = scmp.ne.s32.totalorder %s32_s25, %s675_s10  ;;  %p681_p5 = scmp.lt.s32.totalorder %s675_s10, %s675_s10 }
   0xd   :  { %p682_p6 = por %p681_p5, %p680_p4 }
   0xf   :  { %p683_p7 = pnand %p682_p6, %p676_p3 }
  0x11   :  { %686 = shalt.err (!%p683_p7)
}
  0x12   :  { %s784_s11 = smov 128   ;;  %s785_s12 = smov 8  }
  0x13   :  { %37 = dma.hbm_to_vmem [thread:$0]  %s1207_s1, 2048, %s32_s25, [#allocation7], %s784_s11, %s784_s11, %s785_s12  }
  0x14   :  { %s786_s15 = smov [#allocation3]   ;;  %s787_s17 = smov [#allocation8]  }
  0x15   :  { %s22_s16 = sshll.u32 %s786_s15, 4  ;;  %s43_s18 = sshll.u32 %s787_s17, 4  ;;  %s23_s16 = int_to_ptr.vmem [resolvable:$true] %s22_s16  ;;  %s44_s18 = int_to_ptr.vmem [resolvable:$true] %s43_s18 }
  0x16   :  { %s687_s21 = scalar_lea.hbm %s1206_s0, 128 }
  0x17   :  { %p688_p8 = scmp.ne.s32.totalorder %s1206_s0, %s687_s21  ;;  %p691_p9 = scmp.lt.u32.totalorder %s687_s21, %s1206_s0 }
  0x19   :  { %p693_p10 = pnand %p691_p9, %p688_p8 }
  0x1b   :  { %696 = shalt.err (!%p693_p10)
}
  0x1c   :  { %s697_s1 = scalar_lea.vmem %s23_s16, 128  ;;  %p702_p12 = scmp.lt.s32.totalorder %s23_s16, %s23_s16 }
  0x1d   :  { %p698_p11 = scmp.ne.s32.totalorder %s23_s16, %s697_s1  ;;  %p703_p13 = scmp.lt.s32.totalorder %s697_s1, %s697_s1 }
  0x1f   :  { %p704_p0 = por %p703_p13, %p702_p12 }
  0x21   :  { %p705_p1 = pnand %p704_p0, %p698_p11 }
  0x23   :  { %708 = shalt.err (!%p705_p1)
}
  0x24   :  { %25 = dma.hbm_to_vmem [thread:$0]  %s1206_s0, 128, %s23_s16, [#allocation4]  }
  0x25   :  { %s709_s30 = scalar_lea.hbm %s1208_s2, 2048 }
  0x26   :  { %p710_p2 = scmp.ne.s32.totalorder %s1208_s2, %s709_s30  ;;  %p713_p3 = scmp.lt.u32.totalorder %s709_s30, %s1208_s2 }
  0x28   :  { %p715_p4 = pnand %p713_p3, %p710_p2 }
  0x2a   :  { %718 = shalt.err (!%p715_p4)
}
  0x2b   :  { %s719_s14 = scalar_lea.vmem %s44_s18, 2048  ;;  %p724_p6 = scmp.lt.s32.totalorder %s44_s18, %s44_s18 }
  0x2c   :  { %p720_p5 = scmp.ne.s32.totalorder %s44_s18, %s719_s14  ;;  %p725_p7 = scmp.lt.s32.totalorder %s719_s14, %s719_s14 }
  0x2e   :  { %p726_p8 = por %p725_p7, %p724_p6 }
  0x30   :  { %p727_p9 = pnand %p726_p8, %p720_p5 }
  0x32   :  { %730 = shalt.err (!%p727_p9)
}
  0x33   :  { %49 = dma.hbm_to_vmem [thread:$0]  %s1208_s2, 2048, %s44_s18, [#allocation7], %s784_s11, %s784_s11, %s785_s12  }
  0x34   :  { %s788_s16 = smov [#allocation9]   ;;  %s731_s21 = scalar_lea.hbm %s1209_s3, 2048 }
  0x35   :  { %s55_s17 = sshll.u32 %s788_s16, 4  ;;  %p732_p10 = scmp.ne.s32.totalorder %s1209_s3, %s731_s21  ;;  %s56_s17 = int_to_ptr.vmem [resolvable:$true] %s55_s17 }
  0x36   :  { %p735_p11 = scmp.lt.u32.totalorder %s731_s21, %s1209_s3 }
  0x38   :  { %p737_p12 = pnand %p735_p11, %p732_p10 }
  0x3a   :  { %740 = shalt.err (!%p737_p12)
}
  0x3b   :  { %s741_s1 = scalar_lea.vmem %s56_s17, 2048  ;;  %p746_p0 = scmp.lt.s32.totalorder %s56_s17, %s56_s17 }
  0x3c   :  { %p742_p13 = scmp.ne.s32.totalorder %s56_s17, %s741_s1  ;;  %p747_p1 = scmp.lt.s32.totalorder %s741_s1, %s741_s1 }
  0x3e   :  { %p748_p2 = por %p747_p1, %p746_p0 }
  0x40   :  { %p749_p3 = pnand %p748_p2, %p742_p13 }
  0x42   :  { %752 = shalt.err (!%p749_p3)
}
  0x43   :  { %61 = dma.hbm_to_vmem [thread:$0]  %s1209_s3, 2048, %s56_s17, [#allocation10], %s784_s11, %s784_s11, %s785_s12  }
  0x44   :  { %775 = dma.done.wait [#allocation4], 128  }
  0x45   :  { %776 = vsyncadd [#allocation4], 4294967168 }
  0x46   :  { %777 = dma.done.wait [#allocation7], 4096  }
  0x47   :  { %778 = vsyncadd [#allocation7], 4294963200 }
  0x48   :  { %779 = dma.done.wait [#allocation10], 2048  }
  0x49   :  { %780 = vsyncadd [#allocation10], 4294965248  ;;  %v789_v0 = vmov 0.0   ;;  %vm790_vm0 = vmmov 0   ;;  %v891_v1 = vld [vmem:[#allocation8] sm:$0xff]  ;;  %v893_v2 = vld [vmem:[#allocation8 + $0x8] sm:$0xff] }
  0x4a   :  { %568 = vmatprep.subr.bf16.mxu0 %v789_v0  ;;  %584 = vmatprep.mubr.msk.bf16.mxu0 %vm790_vm0, %v789_v0  ;;  %v182_v3 = vand.u32 2147483647, %v891_v1  ;;  %v183_v4 = vand.u32 2147483647, %v893_v2  ;;  %v897_v5 = vld [vmem:[#allocation8 + $0x10] sm:$0xff]  ;;  %v899_v6 = vld [vmem:[#allocation8 + $0x18] sm:$0xff]  ;;  %vm150_vm3 = vcmp.ne.f32.partialorder %v891_v1, %v891_v1  ;;  %vm151_vm5 = vcmp.ne.f32.partialorder %v893_v2, %v893_v2 }
  0x4b   :  { %v184_v7 = vand.u32 2147483647, %v897_v5  ;;  %v902_v10 = vld [vmem:[#allocation8 + $0x20] sm:$0xff]  ;;  %v185_v11 = vand.u32 2147483647, %v899_v6  ;;  %v905_v13 = vld [vmem:[#allocation8 + $0x28] sm:$0xff]  ;;  %vm152_vm6 = vcmp.ne.f32.partialorder %v897_v5, %v897_v5  ;;  %vm153_vm8 = vcmp.ne.f32.partialorder %v899_v6, %v899_v6 }
  0x4c   :  { %v198_v8 = vsub.f32 0.0, %v182_v3  ;;  %v199_v9 = vsub.f32 0.0, %v183_v4  ;;  %v186_v18 = vand.u32 2147483647, %v902_v10  ;;  %v187_v19 = vand.u32 2147483647, %v905_v13 }
  0x4d   :  { %v200_v12 = vsub.f32 0.0, %v184_v7  ;;  %v201_v16 = vsub.f32 0.0, %v185_v11  ;;  %v909_v20 = vld [vmem:[#allocation8 + $0x30] sm:$0xff]  ;;  %v911_v23 = vld [vmem:[#allocation8 + $0x38] sm:$0xff]  ;;  %v914_v27 = vld [vmem:[#allocation8 + $0x40] sm:$0xff]  ;;  %v134_v31 = vmax.f32 %v891_v1, 0.0  ;;  %vm154_vm11 = vcmp.ne.f32.partialorder %v902_v10, %v902_v10 }
  0x4e   :  { %v214_v14 = vmul.f32 1.442695, %v198_v8  ;;  %v216_v15 = vmul.f32 1.442695, %v199_v9  ;;  %v202_v22 = vsub.f32 0.0, %v186_v18  ;;  %v203_v24 = vsub.f32 0.0, %v187_v19 }
  0x4f   :  { %v218_v17 = vmul.f32 1.442695, %v200_v12  ;;  %v220_v21 = vmul.f32 1.442695, %v201_v16  ;;  %v188_v26 = vand.u32 2147483647, %v909_v20  ;;  %vm155_vm13 = vcmp.ne.f32.partialorder %v905_v13, %v905_v13 }
  0x50   :  { %597 = vpow2.f32 %v214_v14  ;;  %v222_v25 = vmul.f32 1.442695, %v202_v22  ;;  %v916_v28 = vld [vmem:[#allocation8 + $0x48] sm:$0xff]  ;;  %v224_v29 = vmul.f32 1.442695, %v203_v24  ;;  %v135_v32 = vmax.f32 %v893_v2, 0.0 }
  0x51   :  { %599 = vpow2.f32 %v216_v15  ;;  %v189_v30 = vand.u32 2147483647, %v911_v23  ;;  %v204_v33 = vsub.f32 0.0, %v188_v26  ;;  %v190_v35 = vand.u32 2147483647, %v914_v27  ;;  %v923_v37 = vld [vmem:[#allocation8 + $0x50] sm:$0xff] }
  0x52   :  { %601 = vpow2.f32 %v218_v17  ;;  %v191_v36 = vand.u32 2147483647, %v916_v28  ;;  %v136_v38 = vmax.f32 %v897_v5, 0.0  ;;  %v926_v40 = vld [vmem:[#allocation8 + $0x58] sm:$0xff]  ;;  %v192_v41 = vand.u32 2147483647, %v923_v37 }
  0x53   :  { %603 = vpow2.f32 %v220_v21  ;;  %v205_v34 = vsub.f32 0.0, %v189_v30  ;;  %v226_v39 = vmul.f32 1.442695, %v204_v33  ;;  %v137_v42 = vmax.f32 %v899_v6, 0.0  ;;  %v103_v12 = vld [vmem:[#allocation9 + $0x8] sm:$0xff]  ;;  %s791_s28 = smov [#allocation11]  }
  0x54   :  { %605 = vpow2.f32 %v222_v25  ;;  %v138_v43 = vmax.f32 %v902_v10, 0.0  ;;  %v206_v45 = vsub.f32 0.0, %v190_v35  ;;  %v139_v46 = vmax.f32 %v905_v13, 0.0  ;;  %s548_s29 = sshll.u32 %s791_s28, 4  ;;  %s549_s29 = int_to_ptr.vmem [resolvable:$true] %s548_s29 }
  0x55   :  { %607 = vpow2.f32 %v224_v29  ;;  %v228_v44 = vmul.f32 1.442695, %v205_v34  ;;  %v140_v47 = vmax.f32 %v909_v20, 0.0  ;;  %v207_v48 = vsub.f32 0.0, %v191_v36  ;;  %p758_p5 = scmp.lt.s32.totalorder %s549_s29, %s549_s29 }
  0x56   :  { %609 = vpow2.f32 %v226_v39  ;;  %v141_v50 = vmax.f32 %v911_v23, 0.0  ;;  %v230_v51 = vmul.f32 1.442695, %v206_v45  ;;  %v193_v52 = vand.u32 2147483647, %v926_v40 }
  0x57   :  { %611 = vpow2.f32 %v228_v44  ;;  %v935_v57 = vsub.f32 0.0, %v192_v41  ;;  %v937_v4 = vmul.f32 1.442695, %v207_v48  ;;  %vm156_vm14 = vcmp.ne.f32.partialorder %v909_v20, %v909_v20 }
  0x58   :  { %613 = vpow2.f32 %v230_v51  ;;  %v939_v9 = vsub.f32 0.0, %v193_v52  ;;  %vm157_vm0 = vcmp.ne.f32.partialorder %v911_v23, %v911_v23 }
  0x5a   :  { %v598_v49 = vpop.eup %597 }
  0x5b   :  { %v600_v53 = vpop.eup %599  ;;  %v246_v54 = vadd.f32 1.0, %v598_v49  ;;  %v249_v55 = vmul.f32 -0.5, %v598_v49  ;;  %v252_v56 = vand.u32 2147483647, %v598_v49 }
  0x5c   :  { %v602_v58 = vpop.eup %601  ;;  %v255_v59 = vadd.f32 1.0, %v600_v53  ;;  %v258_v60 = vmul.f32 -0.5, %v600_v53  ;;  %v261_v61 = vand.u32 2147483647, %v600_v53 }
  0x5d   :  { %v604_v62 = vpop.eup %603  ;;  %615 = vlog2.f32 %v246_v54  ;;  %v250_v63 = vadd.f32 1.0, %v249_v55  ;;  %v264_v3 = vadd.f32 1.0, %v602_v58  ;;  %v267_v8 = vmul.f32 -0.5, %v602_v58 }
  0x5e   :  { %617 = vlog2.f32 %v255_v59  ;;  %v259_v7 = vadd.f32 1.0, %v258_v60  ;;  %v606_v11 = vpop.eup %605  ;;  %vm941_vm1 = vcmp.lt.f32.partialorder %v252_v56, 0.0004427343  ;;  %v270_v14 = vand.u32 2147483647, %v602_v58 }
  0x5f   :  { %619 = vlog2.f32 %v264_v3  ;;  %v273_v15 = vadd.f32 1.0, %v604_v62  ;;  %v608_v16 = vpop.eup %607  ;;  %vm945_vm2 = vcmp.lt.f32.partialorder %v261_v61, 0.0004427343  ;;  %v268_v18 = vadd.f32 1.0, %v267_v8 }
  0x60   :  { %v276_v19 = vmul.f32 -0.5, %v604_v62  ;;  %v279_v21 = vand.u32 2147483647, %v604_v62  ;;  %v251_v22 = vmul.f32 %v598_v49, %v250_v63  ;;  %v282_v24 = vadd.f32 1.0, %v606_v11  ;;  %v610_v34 = vpop.eup %609 }
  0x61   :  { %621 = vlog2.f32 %v273_v15  ;;  %v285_v25 = vmul.f32 -0.5, %v606_v11  ;;  %v260_v26 = vmul.f32 %v600_v53, %v259_v7  ;;  %vm951_vm4 = vcmp.lt.f32.partialorder %v270_v14, 0.0004427343  ;;  %v612_v41 = vpop.eup %611 }
  0x62   :  { %v277_v30 = vadd.f32 1.0, %v276_v19  ;;  %v288_v33 = vand.u32 2147483647, %v606_v11  ;;  %623 = vlog2.f32 %v282_v24  ;;  %v291_v36 = vadd.f32 1.0, %v608_v16  ;;  %v963_v54 = vpop.eup %613 }
  0x63   :  { %v286_v35 = vadd.f32 1.0, %v285_v25  ;;  %v294_v39 = vmul.f32 -0.5, %v608_v16  ;;  %v269_v44 = vmul.f32 %v602_v58, %v268_v18  ;;  %vm959_vm7 = vcmp.lt.f32.partialorder %v279_v21, 0.0004427343 }
  0x64   :  { %v297_v48 = vand.u32 2147483647, %v608_v16  ;;  %v300_v49 = vadd.f32 1.0, %v610_v34  ;;  %v278_v51 = vmul.f32 %v604_v62, %v277_v30  ;;  %625 = vlog2.f32 %v291_v36 }
  0x65   :  { %v295_v52 = vadd.f32 1.0, %v294_v39  ;;  %v303_v53 = vmul.f32 -0.5, %v610_v34  ;;  %vm967_vm9 = vcmp.lt.f32.partialorder %v288_v33, 0.0004427343  ;;  %v306_v56 = vand.u32 2147483647, %v610_v34 }
  0x66   :  { %627 = vlog2.f32 %v300_v49  ;;  %v309_v58 = vadd.f32 1.0, %v612_v41  ;;  %v287_v60 = vmul.f32 %v606_v11, %v286_v35  ;;  %vm971_vm10 = vcmp.lt.f32.partialorder %v297_v48, 0.0004427343  ;;  %v102_v35 = vld [vmem:[#allocation9] sm:$0xff] }
  0x67   :  { %v616_v59 = vpop.eup %615  ;;  %v304_v62 = vadd.f32 1.0, %v303_v53  ;;  %v312_v63 = vmul.f32 -0.5, %v612_v41  ;;  %v315_v8 = vand.u32 2147483647, %v612_v41  ;;  %v318_v14 = vadd.f32 1.0, %v963_v54 }
  0x68   :  { %v618_v3 = vpop.eup %617  ;;  %v248_v7 = vmul.f32 0.6931472, %v616_v59  ;;  %629 = vlog2.f32 %v309_v58  ;;  %v296_v19 = vmul.f32 %v608_v16, %v295_v52  ;;  %vm978_vm12 = vcmp.lt.f32.partialorder %v306_v56, 0.0004427343  ;;  %v87_v52 = vld [vmem:[#allocation6 + $0x8] sm:$0xff] }
  0x69   :  { %v620_v15 = vpop.eup %619  ;;  %v257_v18 = vmul.f32 0.6931472, %v618_v3  ;;  %v313_v21 = vadd.f32 1.0, %v312_v63  ;;  %631 = vpow2.f32 %v937_v4  ;;  %v321_v30 = vmul.f32 -0.5, %v963_v54  ;;  %v88_v63 = vld [vmem:[#allocation6 + $0x10] sm:$0xff] }
  0x6a   :  { %v254_v24 = vsel %vm941_vm1, %v251_v22, %v248_v7  ;;  %v266_v25 = vmul.f32 0.6931472, %v620_v15  ;;  %v305_v39 = vmul.f32 %v610_v34, %v304_v62  ;;  %633 = vlog2.f32 %v318_v14  ;;  %v104_v34 = vld [vmem:[#allocation9 + $0x10] sm:$0xff] }
  0x6b   :  { %v622_v33 = vpop.eup %621  ;;  %v263_v16 = vsel %vm945_vm2, %v260_v26, %v257_v18  ;;  %v390_v36 = vadd.f32 %v254_v24, %v134_v31  ;;  %vm998_vm15 = vcmp.lt.f32.partialorder %v315_v8, 0.0004427343  ;;  %v86_v26 = vld [vmem:[#allocation6] sm:$0xff]  ;;  %v314_v29 = vmul.f32 %v612_v41, %v313_v21  ;;  %v89_v18 = vld [vmem:[#allocation6 + $0x18] sm:$0xff] }
  0x6c   :  { %v391_v22 = vadd.f32 %v263_v16, %v135_v32  ;;  %v272_v48 = vsel %vm951_vm4, %v269_v44, %v266_v25  ;;  %v275_v4 = vmul.f32 0.6931472, %v622_v33  ;;  %v624_v17 = vpop.eup %623  ;;  %v322_v44 = vadd.f32 1.0, %v321_v30  ;;  %v106_v21 = vld [vmem:[#allocation9 + $0x20] sm:$0xff] }
  0x6d   :  { %v406_v31 = vsel %vm150_vm3, %v891_v1, %v390_v36  ;;  %v392_v32 = vadd.f32 %v272_v48, %v136_v38  ;;  %v284_v59 = vmul.f32 0.6931472, %v624_v17  ;;  %v105_v38 = vld [vmem:[#allocation9 + $0x18] sm:$0xff]  ;;  %v324_v3 = vand.u32 2147483647, %v963_v54  ;;  %v90_v16 = vld [vmem:[#allocation6 + $0x20] sm:$0xff] }
  0x6e   :  { %v407_v53 = vsel %vm151_vm5, %v893_v2, %v391_v22  ;;  %v422_v56 = vmul.f32 %v406_v31, %v102_v35  ;;  %v281_v58 = vsel %vm959_vm7, %v278_v51, %v275_v4  ;;  %v626_v1 = vpop.eup %625  ;;  %v107_v36 = vld [vmem:[#allocation9 + $0x28] sm:$0xff]  ;;  %vm158_vm2 = vcmp.ne.f32.partialorder %v914_v27, %v914_v27 }
  0x6f   :  { %v423_v62 = vmul.f32 %v407_v53, %v103_v12  ;;  %v393_v41 = vadd.f32 %v281_v58, %v137_v42  ;;  %v408_v2 = vsel %vm152_vm6, %v897_v5, %v392_v32  ;;  %v290_v8 = vsel %vm967_vm9, %v287_v60, %v284_v59  ;;  %v91_v17 = vld [vmem:[#allocation6 + $0x28] sm:$0xff]  ;;  %v109_v53 = vld [vmem:[#allocation9 + $0x38] sm:$0xff] }
  0x70   :  { %v628_v45 = vpop.eup %627  ;;  %v438_v51 = vadd.f32 %v422_v56, %v86_v26  ;;  %v424_v7 = vmul.f32 %v408_v2, %v104_v34  ;;  %v293_v14 = vmul.f32 0.6931472, %v626_v1  ;;  %v394_v5 = vadd.f32 %v290_v8, %v138_v43  ;;  %v108_v26 = vld [vmem:[#allocation9 + $0x30] sm:$0xff]  ;;  %v93_v1 = vld [vmem:[#allocation6 + $0x38] sm:$0xff]  ;;  %v1073_v2 = vld [vmem:[#allocation8 + $0x68] sm:$0xff] }
  0x71   :  { %v439_v15 = vadd.f32 %v423_v62, %v87_v52  ;;  %v409_v42 = vsel %vm153_vm8, %v899_v6, %v393_v41  ;;  %v302_v24 = vmul.f32 0.6931472, %v628_v45  ;;  %v234_v60 = vmul.f32 1.442695, %v935_v57  ;;  %v92_v52 = vld [vmem:[#allocation6 + $0x30] sm:$0xff]  ;;  %v1068_v62 = vld [vmem:[#allocation8 + $0x60] sm:$0xff] }
  0x72   :  { %v630_v25 = vpop.eup %629  ;;  %v425_v30 = vmul.f32 %v409_v42, %v105_v38  ;;  %v440_v33 = vadd.f32 %v424_v7, %v88_v63  ;;  %v299_v55 = vsel %vm971_vm10, %v296_v19, %v293_v14  ;;  %v410_v6 = vsel %vm154_vm11, %v902_v10, %v394_v5  ;;  %v1078_v7 = vld [vmem:[#allocation8 + $0x78] sm:$0xff] }
  0x73   :  { %v457_v35 = vpack.c.bf16 %v439_v15, %v438_v51  ;;  %v395_v12 = vadd.f32 %v299_v55, %v139_v46  ;;  %v308_v43 = vsel %vm978_vm12, %v305_v39, %v302_v24  ;;  %v632_v22 = vpop.eup %631  ;;  %v426_v61 = vmul.f32 %v410_v6, %v106_v21 }
  0x74   :  { %v441_v48 = vadd.f32 %v425_v30, %v89_v18  ;;  %v311_v19 = vmul.f32 0.6931472, %v630_v25  ;;  %v396_v57 = vadd.f32 %v308_v43, %v140_v47  ;;  %v634_v4 = vpop.eup %633  ;;  %v323_v10 = vmul.f32 %v963_v54, %v322_v44 }
  0x75   :  { %569 = vmatpush3.bf16.msra.mxu0 %v457_v35  ;;  %v411_v46 = vsel %vm155_vm13, %v905_v13, %v395_v12  ;;  %vm1049_vm1 = vcmp.lt.f32.partialorder %v324_v3, 0.0004427343  ;;  %v327_v39 = vadd.f32 1.0, %v632_v22  ;;  %v442_v34 = vadd.f32 %v426_v61, %v90_v16  ;;  %v1075_v3 = vld [vmem:[#allocation8 + $0x70] sm:$0xff] }
  0x76   :  { %570 = vmatprep.subr.bf16.mxu0 %v789_v0  ;;  %v458_v31 = vpack.c.bf16 %v441_v48, %v440_v33  ;;  %v427_v47 = vmul.f32 %v411_v46, %v107_v36  ;;  %v317_v32 = vsel %vm998_vm15, %v314_v29, %v311_v19  ;;  %v412_v54 = vsel %vm156_vm14, %v909_v20, %v396_v57 }
  0x77   :  { %v397_v13 = vadd.f32 %v317_v32, %v141_v50  ;;  %v320_v44 = vmul.f32 0.6931472, %v634_v4  ;;  %635 = vlog2.f32 %v327_v39  ;;  %v428_v58 = vmul.f32 %v412_v54, %v108_v26  ;;  %v94_v4 = vld [vmem:[#allocation6 + $0x40] sm:$0xff] }
  0x78   :  { %v443_v56 = vadd.f32 %v427_v47, %v91_v17  ;;  %v330_v59 = vmul.f32 -0.5, %v632_v22  ;;  %v142_v29 = vmax.f32 %v914_v27, 0.0  ;;  %637 = vpow2.f32 %v234_v60  ;;  %v110_v60 = vld [vmem:[#allocation9 + $0x40] sm:$0xff]  ;;  %v111_v17 = vld [vmem:[#allocation9 + $0x48] sm:$0xff] }
  0x79   :  { %571 = vmatpush3.bf16.msra.mxu0 %v458_v31  ;;  %v413_v49 = vsel %vm157_vm0, %v911_v23, %v397_v13  ;;  %v236_v50 = vmul.f32 1.442695, %v939_v9  ;;  %v444_v38 = vadd.f32 %v428_v58, %v92_v52  ;;  %v326_v41 = vsel %vm1049_vm1, %v323_v10, %v320_v44  ;;  %v95_v10 = vld [vmem:[#allocation6 + $0x48] sm:$0xff] }
  0x7a   :  { %572 = vmatprep.subr.bf16.mxu0 %v789_v0  ;;  %v459_v20 = vpack.c.bf16 %v443_v56, %v442_v34  ;;  %v429_v63 = vmul.f32 %v413_v49, %v109_v53  ;;  %v331_v45 = vadd.f32 1.0, %v330_v59  ;;  %v333_v51 = vand.u32 2147483647, %v632_v22 }
  0x7b   :  { %639 = vpow2.f32 %v236_v50  ;;  %v194_v9 = vand.u32 2147483647, %v1068_v62  ;;  %v398_v8 = vadd.f32 %v326_v41, %v142_v29  ;;  %v195_v14 = vand.u32 2147483647, %v1073_v2 }
  0x7c   :  { %v445_v23 = vadd.f32 %v429_v63, %v93_v1  ;;  %v196_v21 = vand.u32 2147483647, %v1075_v3  ;;  %v197_v5 = vand.u32 2147483647, %v1078_v7  ;;  %v143_v24 = vmax.f32 %v916_v28, 0.0 }
  0x7d   :  { %573 = vmatpush3.bf16.msra.mxu0 %v459_v20  ;;  %v210_v18 = vsub.f32 0.0, %v194_v9  ;;  %v211_v42 = vsub.f32 0.0, %v195_v14  ;;  %v332_v25 = vmul.f32 %v632_v22, %v331_v45  ;;  %vm1087_vm3 = vcmp.lt.f32.partialorder %v333_v51, 0.0004427343 }
  0x7e   :  { %574 = vmatprep.subr.bf16.mxu0 %v789_v0  ;;  %v460_v15 = vpack.c.bf16 %v445_v23, %v444_v38  ;;  %v414_v35 = vsel %vm158_vm2, %v914_v27, %v398_v8  ;;  %v212_v36 = vsub.f32 0.0, %v196_v21  ;;  %v213_v12 = vsub.f32 0.0, %v197_v5  ;;  %v112_v5 = vld [vmem:[#allocation9 + $0x50] sm:$0xff] }
  0x7f   :  { %v238_v33 = vmul.f32 1.442695, %v210_v18  ;;  %v240_v16 = vmul.f32 1.442695, %v211_v42  ;;  %vm159_vm4 = vcmp.ne.f32.partialorder %v916_v28, %v916_v28  ;;  %v430_v19 = vmul.f32 %v414_v35, %v110_v60  ;;  %v96_v35 = vld [vmem:[#allocation6 + $0x50] sm:$0xff] }
  0x80   :  { %v242_v22 = vmul.f32 1.442695, %v212_v36  ;;  %v244_v48 = vmul.f32 1.442695, %v213_v12  ;;  %v145_v8 = vmax.f32 %v926_v40, 0.0  ;;  %vm160_vm7 = vcmp.ne.f32.partialorder %v923_v37, %v923_v37 }
  0x81   :  { %v636_v55 = vpop.eup %635  ;;  %575 = vmatpush3.bf16.msra.mxu0 %v460_v15  ;;  %641 = vpow2.f32 %v238_v33  ;;  %v446_v47 = vadd.f32 %v430_v19, %v94_v4  ;;  %vm161_vm8 = vcmp.ne.f32.partialorder %v926_v40, %v926_v40  ;;  %v97_v19 = vld [vmem:[#allocation6 + $0x58] sm:$0xff]  ;;  %vm162_vm10 = vcmp.ne.f32.partialorder %v1068_v62, %v1068_v62 }
  0x82   :  { %576 = vmatprep.subr.bf16.mxu0 %v789_v0  ;;  %v329_v6 = vmul.f32 0.6931472, %v636_v55  ;;  %v638_v43 = vpop.eup %637  ;;  %643 = vpow2.f32 %v240_v16  ;;  %v113_v16 = vld [vmem:[#allocation9 + $0x58] sm:$0xff]  ;;  %vm163_vm12 = vcmp.ne.f32.partialorder %v1073_v2, %v1073_v2  ;;  %vm164_vm15 = vcmp.ne.f32.partialorder %v1075_v3, %v1075_v3 }
  0x83   :  { %v336_v57 = vadd.f32 1.0, %v638_v43  ;;  %645 = vpow2.f32 %v242_v22  ;;  %v339_v39 = vmul.f32 -0.5, %v638_v43  ;;  %v342_v54 = vand.u32 2147483647, %v638_v43 }
  0x84   :  { %v335_v61 = vsel %vm1087_vm3, %v332_v25, %v329_v6  ;;  %v146_v22 = vmax.f32 %v1068_v62, 0.0  ;;  %vm165_vm0 = vcmp.ne.f32.partialorder %v1078_v7, %v1078_v7 }
  0x85   :  { %v640_v27 = vpop.eup %639  ;;  %v399_v46 = vadd.f32 %v335_v61, %v143_v24  ;;  %647 = vlog2.f32 %v336_v57  ;;  %v340_v52 = vadd.f32 1.0, %v339_v39  ;;  %vm1102_vm5 = vcmp.lt.f32.partialorder %v342_v54, 0.0004427343 }
  0x86   :  { %v345_v26 = vadd.f32 1.0, %v640_v27  ;;  %649 = vpow2.f32 %v244_v48  ;;  %v348_v34 = vmul.f32 -0.5, %v640_v27  ;;  %v351_v59 = vand.u32 2147483647, %v640_v27 }
  0x87   :  { %v415_v11 = vsel %vm159_vm4, %v916_v28, %v399_v46  ;;  %v144_v28 = vmax.f32 %v923_v37, 0.0  ;;  %v341_v29 = vmul.f32 %v638_v43, %v340_v52  ;;  %v147_v48 = vmax.f32 %v1073_v2, 0.0 }
  0x88   :  { %v431_v31 = vmul.f32 %v415_v11, %v111_v17  ;;  %651 = vlog2.f32 %v345_v26  ;;  %v349_v56 = vadd.f32 1.0, %v348_v34  ;;  %vm1110_vm6 = vcmp.lt.f32.partialorder %v351_v59, 0.0004427343  ;;  %v114_v59 = vld [vmem:[#allocation9 + $0x60] sm:$0xff] }
  0x89   :  { %v148_v54 = vmax.f32 %v1075_v3, 0.0 }
  0x8a   :  { %v447_v32 = vadd.f32 %v431_v31, %v95_v10  ;;  %v350_v45 = vmul.f32 %v640_v27, %v349_v56 }
  0x8b   :  { %v642_v53 = vpop.eup %641 }
  0x8c   :  { %v461_v13 = vpack.c.bf16 %v447_v32, %v446_v47  ;;  %v644_v44 = vpop.eup %643  ;;  %v354_v58 = vadd.f32 1.0, %v642_v53  ;;  %v357_v63 = vmul.f32 -0.5, %v642_v53  ;;  %v360_v55 = vand.u32 2147483647, %v642_v53 }
  0x8d   :  { %v363_v1 = vadd.f32 1.0, %v644_v44  ;;  %v1098_v49 = vpop.eup %645  ;;  %v366_v51 = vmul.f32 -0.5, %v644_v44  ;;  %v369_v6 = vand.u32 2147483647, %v644_v44 }
  0x8e   :  { %577 = vmatpush3.bf16.msra.mxu0 %v461_v13  ;;  %653 = vlog2.f32 %v354_v58  ;;  %v372_v38 = vadd.f32 1.0, %v1098_v49  ;;  %v375_v21 = vmul.f32 -0.5, %v1098_v49  ;;  %v358_v25 = vadd.f32 1.0, %v357_v63 }
  0x8f   :  { %578 = vmatprep.subr.bf16.mxu0 %v789_v0  ;;  %v648_v50 = vpop.eup %647  ;;  %655 = vlog2.f32 %v363_v1  ;;  %v367_v60 = vadd.f32 1.0, %v366_v51  ;;  %v378_v4 = vand.u32 2147483647, %v1098_v49  ;;  %vm1133_vm9 = vcmp.lt.f32.partialorder %v360_v55, 0.0004427343  ;;  %v101_v55 = vld [vmem:[#allocation6 + $0x78] sm:$0xff] }
  0x90   :  { %v1107_v41 = vpop.eup %649  ;;  %v338_v23 = vmul.f32 0.6931472, %v648_v50  ;;  %657 = vlog2.f32 %v372_v38  ;;  %v376_v61 = vadd.f32 1.0, %v375_v21  ;;  %v359_v27 = vmul.f32 %v642_v53, %v358_v25  ;;  %v115_v50 = vld [vmem:[#allocation9 + $0x68] sm:$0xff] }
  0x91   :  { %v381_v15 = vadd.f32 1.0, %v1107_v41  ;;  %v384_v30 = vmul.f32 -0.5, %v1107_v41  ;;  %vm1139_vm11 = vcmp.lt.f32.partialorder %v369_v6, 0.0004427343  ;;  %vm1150_vm13 = vcmp.lt.f32.partialorder %v378_v4, 0.0004427343 }
  0x92   :  { %v652_v9 = vpop.eup %651  ;;  %v344_v18 = vsel %vm1102_vm5, %v341_v29, %v338_v23  ;;  %v377_v52 = vmul.f32 %v1098_v49, %v376_v61  ;;  %v149_v63 = vmax.f32 %v1078_v7, 0.0  ;;  %v98_v23 = vld [vmem:[#allocation6 + $0x60] sm:$0xff]  ;;  %v455_v6 = vld [vmem:[#allocation3] sm:$0xff] }
  0x93   :  { %v347_v42 = vmul.f32 0.6931472, %v652_v9  ;;  %v400_v24 = vadd.f32 %v344_v18, %v144_v28  ;;  %659 = vlog2.f32 %v381_v15  ;;  %v385_v17 = vadd.f32 1.0, %v384_v30  ;;  %v99_v9 = vld [vmem:[#allocation6 + $0x68] sm:$0xff]  ;;  %v116_v15 = vld [vmem:[#allocation9 + $0x70] sm:$0xff] }
  0x95   :  { %v353_v33 = vsel %vm1110_vm6, %v350_v45, %v347_v42  ;;  %v416_v12 = vsel %vm160_vm7, %v923_v37, %v400_v24  ;;  %v368_v37 = vmul.f32 %v644_v44, %v367_v60  ;;  %v386_v56 = vmul.f32 %v1107_v41, %v385_v17  ;;  %v117_v24 = vld [vmem:[#allocation9 + $0x78] sm:$0xff] }
  0x96   :  { %v401_v36 = vadd.f32 %v353_v33, %v145_v8  ;;  %v432_v43 = vmul.f32 %v416_v12, %v112_v5  ;;  %v100_v5 = vld [vmem:[#allocation6 + $0x70] sm:$0xff] }
  0x98   :  { %v417_v57 = vsel %vm161_vm8, %v926_v40, %v401_v36  ;;  %v654_v46 = vpop.eup %653  ;;  %v448_v10 = vadd.f32 %v432_v43, %v96_v35  ;;  %v387_v40 = vand.u32 2147483647, %v1107_v41 }
  0x99   :  { %v433_v26 = vmul.f32 %v417_v57, %v113_v16  ;;  %v656_v39 = vpop.eup %655  ;;  %v356_v31 = vmul.f32 0.6931472, %v654_v46 }
  0x9a   :  { %v365_v32 = vmul.f32 0.6931472, %v656_v39  ;;  %v658_v53 = vpop.eup %657  ;;  %vm1158_vm14 = vcmp.lt.f32.partialorder %v387_v40, 0.0004427343  ;;  %v535_v39 = vlaneseq }
  0x9b   :  { %v449_v34 = vadd.f32 %v433_v26, %v97_v19  ;;  %v362_v13 = vsel %vm1133_vm9, %v359_v27, %v356_v31  ;;  %v374_v29 = vmul.f32 0.6931472, %v658_v53  ;;  %v511_v31 = vld [vmem:[%s1212_s6] sm:$0x1]  ;;  %s753_s6 = scalar_lea.vmem %s549_s29, 128 }
  0x9c   :  { %v371_v1 = vsel %vm1139_vm11, %v368_v37, %v365_v32  ;;  %v402_v28 = vadd.f32 %v362_v13, %v146_v22  ;;  %v456_v22 = vpack.c.bf16 %v455_v6, %v455_v6  ;;  %v510_v32 = vld [vmem:[%s1210_s4] sm:$0x1]  ;;  %p754_p4 = scmp.ne.s32.totalorder %s549_s29, %s753_s6  ;;  %p759_p6 = scmp.lt.s32.totalorder %s753_s6, %s753_s6 }
  0x9d   :  { %v462_v58 = vpack.c.bf16 %v449_v34, %v448_v10  ;;  %v660_v49 = vpop.eup %659  ;;  %v403_v20 = vadd.f32 %v371_v1, %v147_v48  ;;  %v380_v45 = vsel %vm1150_vm13, %v377_v52, %v374_v29  ;;  %v536_v34 = vshrl.u32 %v535_v39, 7 }
  0x9e   :  { %v418_v41 = vsel %vm162_vm10, %v1068_v62, %v402_v28  ;;  %v383_v51 = vmul.f32 0.6931472, %v660_v49  ;;  %v404_v18 = vadd.f32 %v380_v45, %v148_v54  ;;  %p760_p7 = por %p759_p6, %p758_p5 }
  0x9f   :  { %579 = vmatpush3.bf16.msra.mxu0 %v462_v58  ;;  %v419_v8 = vsel %vm163_vm12, %v1073_v2, %v403_v20  ;;  %v434_v14 = vmul.f32 %v418_v41, %v114_v59  ;;  %v537_v53 = vsub.s32 0, %v536_v34 }
  0xa0   :  { %580 = vmatprep.subr.bf16.mxu0 %v789_v0  ;;  %v435_v42 = vmul.f32 %v419_v8, %v115_v50  ;;  %v389_v62 = vsel %vm1158_vm14, %v386_v56, %v383_v51  ;;  %v420_v30 = vsel %vm164_vm15, %v1075_v3, %v404_v18  ;;  %v512_v3 = vld [vmem:[%s1211_s5] sm:$0x1]  ;;  %p761_p8 = pnand %p760_p7, %p754_p4 }
  0xa1   :  { %v450_v21 = vadd.f32 %v434_v14, %v98_v23  ;;  %v405_v25 = vadd.f32 %v389_v62, %v149_v63  ;;  %v436_v33 = vmul.f32 %v420_v30, %v116_v15  ;;  %v516_v48 = vand.u32 2147483647, %v512_v3 }
  0xa2   :  { %v451_v2 = vadd.f32 %v435_v42, %v99_v9  ;;  %v513_v10 = vmax.f32 %v512_v3, 0.0  ;;  %vm514_vm2 = vcmp.ne.f32.partialorder %v512_v3, %v512_v3 }
  0xa3   :  { %v421_v60 = vsel %vm165_vm0, %v1078_v7, %v405_v25  ;;  %v452_v36 = vadd.f32 %v436_v33, %v100_v5  ;;  %v517_v61 = vsub.f32 0.0, %v516_v48 }
  0xa4   :  { %v463_v35 = vpack.c.bf16 %v451_v2, %v450_v21  ;;  %v437_v16 = vmul.f32 %v421_v60, %v117_v24 }
  0xa5   :  { %v518_v19 = vmul.f32 1.442695, %v517_v61 }
  0xa6   :  { %581 = vmatpush3.bf16.msra.mxu0 %v463_v35  ;;  %v453_v12 = vadd.f32 %v437_v16, %v101_v55 }
  0xa7   :  { %582 = vmatprep.subr.bf16.mxu0 %v789_v0  ;;  %661 = vpow2.f32 %v518_v19 }
  0xa8   :  { %v464_v43 = vpack.c.bf16 %v453_v12, %v452_v36 }
  0xaa   :  { %583 = vmatpush3.bf16.msra.mxu0 %v464_v43 }
  0xad   :  { %585 = vmatmul.mubr.bf16.vlgmr.msra.gmra.mrb[0].mxu0 %v456_v22 }
  0xb1   :  { %v662_v7 = vpop.eup %661 }
  0xb2   :  { %v520_v57 = vadd.f32 1.0, %v662_v7  ;;  %v523_v27 = vmul.f32 -0.5, %v662_v7  ;;  %v526_v46 = vand.u32 2147483647, %v662_v7 }
  0xb4   :  { %663 = vlog2.f32 %v520_v57  ;;  %v524_v4 = vadd.f32 1.0, %v523_v27  ;;  %vm527_vm1 = vcmp.lt.f32.partialorder %v526_v46, 0.0004427343 }
  0xb6   :  { %v525_v26 = vmul.f32 %v662_v7, %v524_v4 }
  0xbe   :  { %v664_v17 = vpop.eup %663 }
  0xbf   :  { %v522_v0 = vmul.f32 0.6931472, %v664_v17 }
  0xc1   :  { %v528_v11 = vsel %vm527_vm1, %v525_v26, %v522_v0 }
  0xc2   :  { %v529_v37 = vadd.f32 %v528_v11, %v513_v10 }
  0xc4   :  { %v530_v47 = vsel %vm514_vm2, %v512_v3, %v529_v37 }
  0xc5   :  { %v531_v40 = vmul.f32 %v530_v47, %v511_v31 }
  0xc7   :  { %v532_v52 = vadd.f32 %v531_v40, %v510_v32 }
  0xc9   :  { %v538_v13 = vrot.slane %v532_v52, %v537_v53 }
 0x180   :  { %v499_v54 = vpop.f32.mrb[0].mxu0 }
 0x181   :  { %v540_v44 = vadd.f32 %v538_v13, %v499_v54  ;;  %v586_v56 = vpop.f32.mrb[1].mxu0 }
 0x182   :  { %v502_v58 = vpop.f32.mrb[2].mxu0 }
 0x183   :  { %541 = vst [vmem:[#allocation11] sm:$0xff] %v540_v44  ;;  %v587_v59 = vpop.f32.mrb[3].mxu0 }
 0x184   :  { %764 = shalt.err (!%p761_p8)
}
 0x185   :  { %s765_s8 = scalar_lea.hbm %s1213_s7, 128 }
 0x186   :  { %p766_p9 = scmp.ne.s32.totalorder %s1213_s7, %s765_s8  ;;  %p769_p10 = scmp.lt.u32.totalorder %s765_s8, %s1213_s7 }
 0x188   :  { %p771_p11 = pnand %p769_p10, %p766_p9 }
 0x18a   :  { %774 = shalt.err (!%p771_p11)
}
 0x18b   :  { %551 = dma.vmem_to_hbm [thread:$0]  %s549_s29, 128, %s1213_s7, [#allocation5]  }
 0x18c   :  { %781 = dma.done.wait [#allocation5], 128  }
 0x18d   :  { %782 = vsyncadd [#allocation5], 4294967168 }
 0x18e   :  { %555 = vsyncpa [#allocation4], 1 }
 0x18f   :  { %556 = vsyncpa [#allocation7], 1 }
 0x190   :  { %557 = vsyncpa [#allocation10], 1 }
 0x191   :  { %558 = vsyncpa [#allocation5], 1 }

</bundles_post_ra>
